<compile_context>
chip_gen: v7x
topology: tpu7x:2x2x1
jax: 0.10.0
libtpu: 0.0.40
codegen_flags: <defaults>
</compile_context>

<pallas_src>
import math

import jax
import jax.numpy as jnp
from jax.experimental import pallas as pl
from jax.experimental.pallas import tpu as pltpu


def _make_gather_kernel(ids_per_step: int, tail_count: int):
    """DMA-only gather: up to ids_per_step row copies HBM->HBM per grid step.

    tail_count = number of rows that are valid on EVERY step (the final,
    possibly partial, step has exactly tail_count valid rows).
    """
    full_tail = tail_count == ids_per_step

    def kernel(ids_ref, x_hbm, o_hbm, sem):
        step = pl.program_id(0)
        last = pl.num_programs(0) - 1
        base = step * ids_per_step

        def issue(j):
            src_row = ids_ref[base + j]          # SMEM scalar read (before any wait)
            pltpu.make_async_copy(
                x_hbm.at[src_row], o_hbm.at[base + j], sem
            ).start()

        # Rows j < tail_count exist in every step.
        for j in range(tail_count):
            issue(j)
        # Rows j >= tail_count exist only on non-final steps (tail guard).
        if not full_tail:
            @pl.when(step < last)
            def _issue_rest():
                for j in range(tail_count, ids_per_step):
                    issue(j)

        # Drain: byte accounting on the single shared DMA semaphore.  Every
        # issued copy and every wait descriptor below is exactly one flat row,
        # so bytes signalled == bytes waited.  Waits are guarded identically
        # to their matching starts, so the semaphore never goes negative.
        def drain(j):
            pltpu.make_async_copy(x_hbm.at[0], o_hbm.at[base + j], sem).wait()

        for j in range(tail_count):
            drain(j)
        if not full_tail:
            @pl.when(step < last)
            def _drain_rest():
                for j in range(tail_count, ids_per_step):
                    drain(j)

    return kernel


def index_model_forward(x, position_ids, *, force_pallas=False, ids_per_step=None):
    """Pallas equivalent of `x[position_ids]` (gather along dim 0)."""
    B = x.shape[0]
    trailing = x.shape[1:]
    row_elems = math.prod(trailing) if trailing else 1
    row_bytes = row_elems * jnp.dtype(x.dtype).itemsize

    ids = jnp.asarray(position_ids, dtype=jnp.int32).reshape(-1)
    n_idx = int(ids.shape[0])
    if n_idx == 0:
        return jnp.zeros((0,) + trailing, dtype=x.dtype)

    # PyTorch indexing semantics: negative ids wrap.
    # TODO(synk): torch raises IndexError for out-of-range ids; we clamp.
    ids = jnp.where(ids < 0, ids + B, ids)
    ids = jnp.clip(ids, 0, B - 1)

    # Small gathers: XLA's fused gather beats per-row DMA issue/completion
    # latency.  Require a larger total when rows are tiny.
    if not force_pallas:
        min_total = (4 << 20) if row_bytes < (4 << 10) else (1 << 20)
        if n_idx * row_bytes <= min_total:
            return jnp.take(x, ids, axis=0)

    # Adaptive per-step batch: target ~512 KiB of copies in flight, cap the
    # static unroll at 32 (v5e scalar slots), and keep >= 2 grid steps when
    # possible so both v7x TensorCores get work on the "parallel" axis.
    MAX_IDS_PER_STEP = 32
    TARGET_BYTES_IN_FLIGHT = 512 * 1024
    if ids_per_step is None:
        ids_per_step = max(1, min(MAX_IDS_PER_STEP,
                                  TARGET_BYTES_IN_FLIGHT // max(row_bytes, 1)))
        ids_per_step = min(ids_per_step, max(1, pl.cdiv(n_idx, 2)))
    ids_per_step = max(1, min(int(ids_per_step), n_idx))
    n_steps = pl.cdiv(n_idx, ids_per_step)
    tail_count = n_idx - (n_steps - 1) * ids_per_step  # valid rows on last step

    # Flatten rows so each gather DMA is one contiguous 1-D transfer.
    x_flat = x.reshape(B, row_elems)

    out_flat = pl.pallas_call(
        _make_gather_kernel(ids_per_step, tail_count),
        grid_spec=pltpu.PrefetchScalarGridSpec(
            num_scalar_prefetch=1,                       # ids -> SMEM
            grid=(n_steps,),
            in_specs=[pl.BlockSpec(memory_space=pl.ANY)],   # x stays in HBM
            out_specs=pl.BlockSpec(memory_space=pl.ANY),    # gather straight to HBM
            scratch_shapes=[pltpu.SemaphoreType.DMA(())],   # one shared DMA sem
        ),
        out_shape=jax.ShapeDtypeStruct((n_idx, row_elems), x.dtype),
        compiler_params=pltpu.CompilerParams(
            dimension_semantics=("parallel",),   # steps write disjoint output rows
        ),
        cost_estimate=pl.CostEstimate(
            flops=0,
            transcendentals=0,
            bytes_accessed=2 * n_idx * row_bytes,
        ),
    )(ids, x_flat)

    return out_flat.reshape((n_idx,) + trailing)


if __name__ == "__main__":
    key = jax.random.PRNGKey(0)
    k1, k2 = jax.random.split(key)

    # Case 1: the module's literal case -- position_ids = [0], NCHW input.
    x = jax.random.normal(k1, (2, 4, 16, 16), dtype=jnp.float32)
    position_ids = jnp.array([0], dtype=jnp.int32)
    ref = x[position_ids]

    # Exercise the Pallas DMA-gather path explicitly.
    out = jax.block_until_ready(index_model_forward(x, position_ids, force_pallas=True))
    assert out.shape == (1, 4, 16, 16), out.shape
    assert jnp.array_equal(out, ref), "mismatch vs reference (pallas path)"

    # Default path short-circuits tiny gathers to a plain XLA take.
    out_fast = jax.block_until_ready(index_model_forward(x, position_ids))
    assert jnp.array_equal(out_fast, ref), "mismatch vs reference (fast path)"

    # Case 2: bigger gather exercising multiple grid steps, the tail guard
    # (n_idx=10, ids_per_step=4 -> 3 steps, tail_count=2) and negative indices.
    x2 = jax.random.normal(k2, (16, 4, 16, 16), dtype=jnp.float32)
    ids2 = jnp.array([3, 0, 15, 7, -1, 1, 9, 2, 14, 5], dtype=jnp.int32)
    ref2 = x2[ids2]
    out2 = jax.block_until_ready(
        index_model_forward(x2, ids2, force_pallas=True, ids_per_step=4))
    assert out2.shape == (10, 4, 16, 16), out2.shape
    assert jnp.array_equal(out2, ref2), "mismatch vs reference (multi-step pallas path)"

    # Same gather through the default (adaptive / fallback) path.
    out2_fast = jax.block_until_ready(index_model_forward(x2, ids2))
    assert jnp.array_equal(out2_fast, ref2), "mismatch vs reference (fast path 2)"

    print("KERNEL_OK")
</pallas_src>

<mosaic_0001>
module attributes {stable_mosaic.version = 11 : i64} {
  func.func @kernel(%arg0: i32, %arg1: memref<1xi32, #tpu.memory_space<smem>>, %arg2: memref<2x1024xf32, #tpu.memory_space<any>>, %arg3: memref<1x1024xf32, #tpu.memory_space<any>>, %arg4: memref<!tpu.dma_semaphore, #tpu.memory_space<semaphore_mem>>) attributes {dimension_semantics = [#tpu.dimension_semantics<parallel>], iteration_bounds = array<i64: 1>, scalar_prefetch = 1 : i64, scratch_operands = 1 : i64, tpu.core_type = #tpu.core_type<tc>, window_params = [{}, {}]} {
    %c1_i32 = arith.constant 1 : i32
    %0 = arith.muli %arg0, %c1_i32 : i32
    %c0_i32 = arith.constant 0 : i32
    %1 = arith.addi %0, %c0_i32 : i32
    %2 = arith.index_cast %1 : i32 to index
    %3 = memref.load %arg1[%2] : memref<1xi32, #tpu.memory_space<smem>>
    %c0_i32_0 = arith.constant 0 : i32
    %4 = arith.addi %0, %c0_i32_0 : i32
    %c0_i32_1 = arith.constant 0 : i32
    %5 = tpu.memref_slice %arg2[%3, %c0_i32_1] : memref<2x1024xf32, #tpu.memory_space<any>> -> memref<1x1024xf32, #tpu.memory_space<any>>
    %6 = tpu.memref_squeeze %5 : memref<1x1024xf32, #tpu.memory_space<any>> -> memref<1024xf32, #tpu.memory_space<any>>
    %c0_i32_2 = arith.constant 0 : i32
    %7 = tpu.memref_slice %arg3[%4, %c0_i32_2] : memref<1x1024xf32, #tpu.memory_space<any>> -> memref<1x1024xf32, #tpu.memory_space<any>>
    %8 = tpu.memref_squeeze %7 : memref<1x1024xf32, #tpu.memory_space<any>> -> memref<1024xf32, #tpu.memory_space<any>>
    tpu.enqueue_dma source(%6 : memref<1024xf32, #tpu.memory_space<any>>) target(%8 : memref<1024xf32, #tpu.memory_space<any>>) target_semaphore(%arg4 : memref<!tpu.dma_semaphore, #tpu.memory_space<semaphore_mem>>)
    %c0_i32_3 = arith.constant 0 : i32
    %9 = arith.addi %0, %c0_i32_3 : i32
    %c0_i32_4 = arith.constant 0 : i32
    %c0_i32_5 = arith.constant 0 : i32
    %10 = tpu.memref_slice %arg2[%c0_i32_4, %c0_i32_5] : memref<2x1024xf32, #tpu.memory_space<any>> -> memref<1x1024xf32, #tpu.memory_space<any>>
    %11 = tpu.memref_squeeze %10 : memref<1x1024xf32, #tpu.memory_space<any>> -> memref<1024xf32, #tpu.memory_space<any>>
    %c0_i32_6 = arith.constant 0 : i32
    %12 = tpu.memref_slice %arg3[%9, %c0_i32_6] : memref<1x1024xf32, #tpu.memory_space<any>> -> memref<1x1024xf32, #tpu.memory_space<any>>
    %13 = tpu.memref_squeeze %12 : memref<1x1024xf32, #tpu.memory_space<any>> -> memref<1024xf32, #tpu.memory_space<any>>
    tpu.wait_dma2 semaphore(%arg4 : memref<!tpu.dma_semaphore, #tpu.memory_space<semaphore_mem>>) src(%11 : memref<1024xf32, #tpu.memory_space<any>>) dst(%13 : memref<1024xf32, #tpu.memory_space<any>>)
    return
  }
}

</mosaic_0001>

<bundles_post_ra>
// kernel: tpu_custom_call.1
= control target key start
LH: loop header
LB: loop body
LE: loop exit
PB: predicated region body
PF: predicated region fallthrough
CT: control target
= control target key end

     0   :  { %s60_s17 = smov 32   ;;  %s61_s22 = smov 16   ;;  %s93_s0 = inlined_call_operand.<no memory space> [shape: s32[1], index: 0, kind: input, shape index: {}]   ;;  %s94_s1 = inlined_call_operand.hbm [shape: f32[2,1024], index: 1, kind: input, shape index: {}]   ;;  %s95_s2 = inlined_call_operand.hbm [shape: f32[1,1024], index: 2, kind: output, shape index: {}]  }
   0x1   :  { %s9_s11 = sshrl.u32 %s93_s0, 1  ;;  %s10_s14 = sand.u32 1, %s93_s0  }
   0x2   :  { %s49_s15 = sshll.u32 %s9_s11, 4  ;;  %30 = sst [smem:[#allocation6]] %s60_s17 }
   0x3   :  { %s12_s16 = sadd.s32 %s49_s15, %s10_s14  ;;  %32 = sst [smem:[#allocation6 + $0x1]] %s61_s22 }
   0x4   :  { %s50_s18 = sshll.u32 %s12_s16, 4  ;;  %s62_s23 = smov 1  }
   0x5   :  { %s14_s21 = scalar_lea.hbm %s94_s1, %s50_s18  ;;  %34 = sst [smem:[#allocation6 + $0x2]] %s62_s23 }
   0x6   :  { %s63_s24 = smov [#allocation2]   ;;  %s64_s25 = smov [#allocation5]  }
   0x7   :  { %s65_s26 = smov 0  }
   0x8   :  { %36 = dma.general %s14_s21, 128, %s95_s2, %s63_s24, %s64_s25, [#allocation6], %s65_s26, 0  }
   0x9   :  { %58 = dma.done.wait [#allocation2], 128 }
   0xa   :  { %59 = vsyncadd [#allocation2], 4294967168 }
   0xb   :  { %39 = vsyncmov [#allocation2] }
   0xe   :  { %s40_s0 = vpop.sfrf %39 }
   0xf   :  { %p51_p0 = scmp.ne.s32.totalorder %s40_s0, 0 }
  0x11   :  { %44 = shalt.err (%p51_p0)  }

</bundles_post_ra>
